<compile_context>
chip_gen: v5e
topology: v5e:2x2
jax: 0.10.0
libtpu: 0.0.40
codegen_flags: <defaults>
</compile_context>

<pallas_src>
import jax
import jax.numpy as jnp
from jax.experimental import pallas as pl
from jax.experimental.pallas import tpu as pltpu


def _ccg_dlnn_node_kernel(x_ref, w_ref, b_ref, o_ref):
    # x_ref: (TILE_R, K)    VMEM, caller dtype (K = n_inputs * pack, lane-dense)
    # w_ref: (K, PACK)      VMEM, caller dtype (block-diagonal weight copies)
    # b_ref: (1, 1)         SMEM f32 (bias scalar)
    # o_ref: (TILE_R, PACK) VMEM f32
    z = jnp.dot(x_ref[...], w_ref[...], preferred_element_type=jnp.float32)
    o_ref[...] = jax.nn.sigmoid(z + b_ref[0, 0]).astype(o_ref.dtype)


def _round_up(x, m):
    return ((x + m - 1) // m) * m


def _pack_factor(n_inputs):
    # Fold `pack` batch rows into one 128-lane row when n_inputs divides 128.
    if n_inputs <= 128 and 128 % n_inputs == 0:
        return 128 // n_inputs
    return 1  # TODO(synk): n_inputs not dividing 128 stays un-packed (still correct).


def build_block_diag_weight(weight, n_inputs, dtype=jnp.float32):
    """(1, n_inputs) nn.Linear weight -> (n_inputs*pack, pack) block-diagonal.

    Column j holds the weight row at rows [j*n_inputs, (j+1)*n_inputs) so
    packed_x @ w_bd reproduces the per-row dot products. Precompute this once
    per weight update and pass it to ccg_dlnn_node_forward (hoisted out of the
    per-call hot path).
    """
    pack = _pack_factor(n_inputs)
    w_row = weight.reshape(n_inputs).astype(dtype)
    return jnp.kron(jnp.eye(pack, dtype=dtype), w_row.reshape(n_inputs, 1))


# Double-buffered (in + out) working-set cap and explicit scoped-VMEM limit.
# 20 MiB working set + 32 MiB limit is safe on v5e/v6e (128 MiB physical) and
# v7x (64 MiB physical per TC).
_VMEM_WORKING_BUDGET = 20 * 1024 * 1024
_VMEM_LIMIT_BYTES = 32 * 1024 * 1024


def ccg_dlnn_node_forward(x, weight, bias, *, tile_rows=8192, w_bd=None):
    """Pallas equivalent of CCG_DLNN_Node.forward: sigmoid(x @ W.T + b).

    Args:
      x:      (batch, n_inputs) array (f32 or bf16; caller dtype is streamed).
      weight: (1, n_inputs) array (torch nn.Linear layout).
      bias:   (1,) array.
      tile_rows: max packed rows per streamed tile (8192 ~= 4 MiB f32 tiles;
        v7x tolerates ~16384).  # TODO(synk): auto-bump per device generation.
      w_bd:   optional precomputed block-diagonal weight from
              build_block_diag_weight (avoids re-building it every call).
    Returns:
      (batch, 1) float32.
    """
    batch, n_inputs = x.shape
    pack = _pack_factor(n_inputs)
    k = n_inputs * pack
    in_dt = x.dtype
    itemsize = jnp.dtype(in_dt).itemsize

    if w_bd is None:
        w_bd = build_block_diag_weight(weight, n_inputs, dtype=in_dt)
    else:
        w_bd = w_bd.astype(in_dt)
    b = jnp.asarray(bias, jnp.float32).reshape(1, 1)

    # Only align the batch to the pack factor (<= pack-1 extra rows); no
    # padding to a multiple of the tile -- the grid uses cdiv and Pallas masks
    # the partial last block.
    batch_pad = _round_up(batch, pack)
    if batch_pad != batch:
        x = jnp.pad(x, ((0, batch_pad - batch), (0, 0)))
    rows = batch_pad // pack
    x_packed = x.reshape(rows, k)  # free row-major reshape

    # Tile selection: as big as possible (amortize ~0.35 us/step), but keep
    # >= 4 grid steps for v7x megacore sharding + pipeline overlap, keep the
    # sublane alignment for the dtype, and clamp to the VMEM budget.
    sub = 8 if itemsize >= 4 else 8 * (4 // itemsize)  # bf16 -> 16 sublanes
    tile_r = max(sub, _round_up(tile_rows, sub))
    tile_r = min(tile_r, max(sub, _round_up(pl.cdiv(rows, 4), sub)))
    bytes_per_packed_row = 2 * (k * itemsize + pack * 4)  # 2-deep in + out bufs
    vmem_tile_cap = max(sub, (_VMEM_WORKING_BUDGET // bytes_per_packed_row) // sub * sub)
    tile_r = min(tile_r, vmem_tile_cap)

    grid = (pl.cdiv(rows, tile_r),)

    cost = pl.CostEstimate(
        flops=2 * rows * k * pack,
        transcendentals=rows * pack,
        bytes_accessed=rows * k * itemsize + k * pack * itemsize + rows * pack * 4,
    )

    # TODO(synk): the (rows, pack) output is lane-narrow (masked vst on v5e);
    # regrouping to 128-wide rows in-kernel would recover a final few %.
    out_packed = pl.pallas_call(
        _ccg_dlnn_node_kernel,
        out_shape=jax.ShapeDtypeStruct((rows, pack), jnp.float32),
        grid_spec=pltpu.PrefetchScalarGridSpec(
            num_scalar_prefetch=0,
            grid=grid,
            in_specs=[
                pl.BlockSpec((tile_r, k), lambda i: (i, 0)),        # streamed x
                pl.BlockSpec((k, pack), lambda i: (0, 0)),          # resident W
                pl.BlockSpec(memory_space=pltpu.MemorySpace.SMEM),  # bias scalar
            ],
            out_specs=pl.BlockSpec((tile_r, pack), lambda i: (i, 0)),
        ),
        compiler_params=pltpu.CompilerParams(
            dimension_semantics=("parallel",),
            vmem_limit_bytes=_VMEM_LIMIT_BYTES,
        ),
        cost_estimate=cost,
    )(x_packed, w_bd, b)

    # (rows, pack) is row-major identical to (batch_pad, 1); unpack & trim the
    # <= pack-1 alignment rows.
    return out_packed.reshape(batch_pad, 1)[:batch]


if __name__ == "__main__":
    n_inputs = 32
    batch = 300
    weight_multiplier = 0.5

    key = jax.random.PRNGKey(0)
    kx, kw, kb, kx2 = jax.random.split(key, 4)

    x = jax.random.normal(kx, (batch, n_inputs), dtype=jnp.float32)
    # Deterministic init mirroring nn.init.uniform_(-wm, wm) on weight & bias.
    weight = jax.random.uniform(
        kw, (1, n_inputs), minval=-weight_multiplier, maxval=weight_multiplier,
        dtype=jnp.float32)
    bias = jax.random.uniform(
        kb, (1,), minval=-weight_multiplier, maxval=weight_multiplier,
        dtype=jnp.float32)

    # Hoisted block-diagonal weight, reused across calls.
    w_bd = build_block_diag_weight(weight, n_inputs, dtype=jnp.float32)

    out = jax.block_until_ready(
        ccg_dlnn_node_forward(x, weight, bias, w_bd=w_bd))
    ref = jax.nn.sigmoid(x @ weight.T + bias)
    assert out.shape == (batch, 1), out.shape
    assert jnp.allclose(out, ref, atol=1e-5, rtol=1e-5), (
        float(jnp.max(jnp.abs(out - ref))))

    # Tail path: batch not a multiple of the pack factor and smaller than one
    # tile (single masked partial block, tiny pack-alignment pad).
    x2 = jax.random.normal(kx2, (9, n_inputs), dtype=jnp.float32)
    out2 = jax.block_until_ready(
        ccg_dlnn_node_forward(x2, weight, bias, w_bd=w_bd))
    ref2 = jax.nn.sigmoid(x2 @ weight.T + bias)
    assert out2.shape == (9, 1), out2.shape
    assert jnp.allclose(out2, ref2, atol=1e-5, rtol=1e-5)

    # Reduced-precision input path (halves HBM read traffic; f32 accumulation
    # inside the kernel).
    xb = x.astype(jnp.bfloat16)
    out3 = jax.block_until_ready(ccg_dlnn_node_forward(xb, weight, bias))
    wb = weight.astype(jnp.bfloat16).astype(jnp.float32)
    ref3 = jax.nn.sigmoid(xb.astype(jnp.float32) @ wb.T + bias)
    assert out3.shape == (batch, 1), out3.shape
    assert jnp.allclose(out3, ref3, atol=2e-2, rtol=2e-2)

    print("KERNEL_OK")
</pallas_src>

<mosaic_0001>
module attributes {stable_mosaic.version = 11 : i64} {
  func.func @_ccg_dlnn_node_kernel(%arg0: i32, %arg1: memref<24x128xf32, #tpu.memory_space<vmem>>, %arg2: memref<128x4xf32, #tpu.memory_space<vmem>>, %arg3: memref<1x1xf32, #tpu.memory_space<smem>>, %arg4: memref<24x4xf32, #tpu.memory_space<vmem>>) attributes {dimension_semantics = [#tpu.dimension_semantics<parallel>], iteration_bounds = array<i64: 4>, scalar_prefetch = 0 : i64, scratch_operands = 0 : i64, tpu.core_type = #tpu.core_type<tc>, window_params = [{transform_indices = @transform_0, window_bounds = array<i64: 24, 128>}, {pipeline_mode = #tpu.pipeline_mode<synchronous>, transform_indices = @transform_1, window_bounds = array<i64: 128, 4>}, {transform_indices = @transform_2, window_bounds = array<i64: 1, 1>}, {transform_indices = @transform_3, window_bounds = array<i64: 24, 4>}]} {
    %c0 = arith.constant 0 : index
    %c0_0 = arith.constant 0 : index
    %0 = vector.load %arg1[%c0, %c0_0] : memref<24x128xf32, #tpu.memory_space<vmem>>, vector<24x128xf32>
    %c0_1 = arith.constant 0 : index
    %c0_2 = arith.constant 0 : index
    %1 = vector.load %arg2[%c0_1, %c0_2] : memref<128x4xf32, #tpu.memory_space<vmem>>, vector<128x4xf32>
    %cst = arith.constant dense<0.000000e+00> : vector<24x4xf32>
    %2 = tpu.matmul %0, %1, %cst {dimension_numbers = #tpu.dot_dimension_numbers<[1], [0], [0], [1], [0, 0, 1, 1], [], []>} : vector<24x128xf32>, vector<128x4xf32>, vector<24x4xf32> -> vector<24x4xf32>
    %c0_3 = arith.constant 0 : index
    %c0_4 = arith.constant 0 : index
    %3 = memref.load %arg3[%c0_3, %c0_4] : memref<1x1xf32, #tpu.memory_space<smem>>
    %4 = vector.broadcast %3 : f32 to vector<24x4xf32>
    %5 = arith.addf %2, %4 : vector<24x4xf32>
    %6 = arith.negf %5 : vector<24x4xf32>
    %7 = math.exp %6 : vector<24x4xf32>
    %cst_5 = arith.constant 1.000000e+00 : f32
    %8 = vector.broadcast %cst_5 : f32 to vector<24x4xf32>
    %9 = arith.addf %8, %7 : vector<24x4xf32>
    %10 = arith.divf %8, %9 : vector<24x4xf32>
    %c0_6 = arith.constant 0 : index
    %c0_7 = arith.constant 0 : index
    %11 = vector.load %arg4[%c0_6, %c0_7] : memref<24x4xf32, #tpu.memory_space<vmem>>, vector<24x4xf32>
    tpu.vector_store %arg4[%c0_6, %c0_7], %10 {strides = array<i32>} : memref<24x4xf32, #tpu.memory_space<vmem>>, vector<24x4xf32>,
    return
  }
  func.func @transform_0(%arg0: i32) -> (i32, i32) {
    %c0_i32 = arith.constant 0 : i32
    %c0_i32_0 = arith.constant 0 : i32
    return %arg0, %c0_i32 : i32, i32
  }
  func.func @transform_1(%arg0: i32) -> (i32, i32) {
    %c0_i32 = arith.constant 0 : i32
    %c0_i32_0 = arith.constant 0 : i32
    %c0_i32_1 = arith.constant 0 : i32
    return %c0_i32, %c0_i32_0 : i32, i32
  }
  func.func @transform_2(%arg0: i32) -> (i32, i32) {
    %c0_i32 = arith.constant 0 : i32
    %c0_i32_0 = arith.constant 0 : i32
    %c0_i32_1 = arith.constant 0 : i32
    return %c0_i32, %c0_i32_0 : i32, i32
  }
  func.func @transform_3(%arg0: i32) -> (i32, i32) {
    %c0_i32 = arith.constant 0 : i32
    %c0_i32_0 = arith.constant 0 : i32
    return %arg0, %c0_i32 : i32, i32
  }
}

</mosaic_0001>

<bundles_post_ra>
// kernel: tpu_custom_call.1
= control target key start
LH: loop header
LB: loop body
LE: loop exit
PB: predicated region body
PF: predicated region fallthrough
CT: control target
= control target key end

     0   :  { %s933_s0 = inlined_call_operand.vmem [shape: f32[75,128], index: 0, kind: input, shape index: {}]   ;;  %s934_s1 = inlined_call_operand.vmem [shape: f32[128,4], index: 1, kind: input, shape index: {}]   ;;  %s935_s2 = inlined_call_operand.<no memory space> [shape: f32[1,1], index: 2, kind: input, shape index: {}]   ;;  %s936_s3 = inlined_call_operand.vmem [shape: f32[75,4], index: 3, kind: output, shape index: {}]  }
   0x1   :  { %8 = sst [smem:[#allocation2]] %s935_s2 }
   0x2   :  { %s799_s14 = smov 0   ;;  %s801_s15 = smov 0  }
   0x3   :  { %s803_s16 = smov 0  }
   0x4 LB: > { %s812_s2 = sadd.s32 4294967295, %s742_s16   ;;  %s814_s17 = sadd.s32 1, %s742_s16   ;;  %s742_s16 = sphi %s803_s16, %s940_s16   ;;  %s738_s15 = sphi %s801_s15, %s939_s15   ;;  %s734_s14 = sphi %s799_s14, %s938_s14  }
   0x5   : > { %s86_s18 = ssub.s32 %s742_s16, %s814_s17  ;;  %s89_s19 = sadd.s32 1, %s738_s15 }
   0x6   : > { %p87_p0 = scmp.eq.s32.totalorder %s86_s18, 0  ;;  %p99_p1 = scmp.ne.s32.totalorder %s738_s15, %s734_s14 }
   0x7   : > { %p100_p2 = scmp.eq.s32.totalorder %s812_s2, 3  ;;  %p530_p3 = scmp.ge.s32.totalorder %s742_s16, 1 }
   0x8   : > { %s822_s20 = scalar_select %p87_p0, %s738_s15, %s89_s19  }
   0x9   : > { %p824_p4 = por %p100_p2, %p99_p1  ;;  %p147_p5 = scmp.lt.s32.totalorder %s742_s16, 5 }
   0xb   : > { %p148_p6 = pnand %p530_p3, %p147_p5 }
   0xc   : > { %s850_s9 = smul.u32 (!%p148_p6), 3, %s812_s2  ;;  %s212_s12 = sld [smem:[#allocation2]] (!%p148_p6) }
   0xd   : > { %151 = sbr.rel (%p148_p6) target bundleno = 268 (0x10c), region = 32  ;;  %s171_s13 = sand.u32 (!%p148_p6), 1, %s734_s14  }
   0xe   : > { %p179_p7 = scmp.lt.s32.totalorder (!%p148_p6), %s850_s9, 9  ;;  %s580_s16 = smul.u32 (!%p148_p6), 24, %s171_s13 }
  0x10   : > { %s885_s14 = scalar_lea.vmem (!%p148_p6), [#allocation3], %s580_s16  }
  0x12   : > { %v211_v0 = vld [vmem:[%s934_s1 + $0x78] sm:$0xff]  ;;  %v210_v1 = vld [vmem:[%s934_s1 + $0x70] sm:$0xff]  ;;  %v209_v2 = vld [vmem:[%s934_s1 + $0x68] sm:$0xff]  ;;  %s180_s23 = scalar_select %p179_p7, %s850_s9, 9  ;;  %v213_v19 = vstv %s212_s12  ;;  %vm297_vm5 = vcmask 31744  }
  0x13   : > { %214 = vmatpush.msra.mxu0 %v211_v0  ;;  %548 = vmatpush.msra.mxu1 %v211_v0  ;;  %v208_v3 = vld [vmem:[%s934_s1 + $0x60] sm:$0xff]  ;;  %v207_v4 = vld [vmem:[%s934_s1 + $0x58] sm:$0xff]  ;;  %v206_v5 = vld [vmem:[%s934_s1 + $0x50] sm:$0xff]  ;;  %s309_s18 = ssub.s32 (%p824_p4), 10, %s850_s9  ;;  %s547_s19 = smul.u32 (%p824_p4), 24, %s812_s2 }
  0x14   : > { %549 = vmatpush.msra.mxu2 %v211_v0  ;;  %v205_v6 = vld [vmem:[%s934_s1 + $0x48] sm:$0xff]  ;;  %v204_v7 = vld [vmem:[%s934_s1 + $0x40] sm:$0xff]  ;;  %v203_v8 = vld [vmem:[%s934_s1 + $0x38] sm:$0xff]  ;;  %s531_s28 = sshll.u32 %s180_s23, 3  ;;  %p310_p8 = scmp.lt.s32.totalorder (%p824_p4), %s309_s18, 3 }
  0x15   : > { %215 = vmatpush.msra.mxu0 %v210_v1  ;;  %550 = vmatpush.msra.mxu1 %v210_v1  ;;  %v202_v9 = vld [vmem:[%s934_s1 + $0x30] sm:$0xff]  ;;  %v201_v10 = vld [vmem:[%s934_s1 + $0x28] sm:$0xff]  ;;  %v200_v11 = vld [vmem:[%s934_s1 + $0x20] sm:$0xff]  ;;  %s182_s8 = scalar_lea.vmem %s933_s0, %s531_s28  ;;  %s900_s24 = scalar_lea.vmem (%p824_p4), %s936_s3, %s547_s19  }
  0x16   : > { %551 = vmatpush.msra.mxu2 %v210_v1  ;;  %v199_v12 = vld [vmem:[%s934_s1 + $0x18] sm:$0xff]  ;;  %v198_v13 = vld [vmem:[%s934_s1 + $0x10] sm:$0xff]  ;;  %v197_v14 = vld [vmem:[%s934_s1 + $0x8] sm:$0xff] }
  0x17   : > { %216 = vmatpush.msra.mxu0 %v209_v2  ;;  %552 = vmatpush.msra.mxu1 %v209_v2  ;;  %v196_v15 = vld [vmem:[%s934_s1] sm:$0xff]  ;;  %v194_v17 = vld [vmem:[%s182_s8 + $0x8] sm:$0xff]  ;;  %v195_v18 = vld [vmem:[%s182_s8 + $0x10] sm:$0xff] }
  0x18   : > { %553 = vmatpush.msra.mxu2 %v209_v2  ;;  %v193_v16 = vld [vmem:[%s182_s8] sm:$0xff] }
  0x19   : > { %217 = vmatpush.msra.mxu0 %v208_v3  ;;  %554 = vmatpush.msra.mxu1 %v208_v3 }
  0x1a   : > { %555 = vmatpush.msra.mxu2 %v208_v3 }
  0x1b   : > { %218 = vmatpush.msra.mxu0 %v207_v4  ;;  %556 = vmatpush.msra.mxu1 %v207_v4 }
  0x1c   : > { %557 = vmatpush.msra.mxu2 %v207_v4 }
  0x1d   : > { %219 = vmatpush.msra.mxu0 %v206_v5  ;;  %558 = vmatpush.msra.mxu1 %v206_v5 }
  0x1e   : > { %559 = vmatpush.msra.mxu2 %v206_v5 }
  0x1f   : > { %220 = vmatpush.msra.mxu0 %v205_v6  ;;  %560 = vmatpush.msra.mxu1 %v205_v6 }
  0x20   : > { %561 = vmatpush.msra.mxu2 %v205_v6 }
  0x21   : > { %221 = vmatpush.msra.mxu0 %v204_v7  ;;  %562 = vmatpush.msra.mxu1 %v204_v7 }
  0x22   : > { %563 = vmatpush.msra.mxu2 %v204_v7 }
  0x23   : > { %222 = vmatpush.msra.mxu0 %v203_v8  ;;  %564 = vmatpush.msra.mxu1 %v203_v8 }
  0x24   : > { %565 = vmatpush.msra.mxu2 %v203_v8 }
  0x25   : > { %223 = vmatpush.msra.mxu0 %v202_v9  ;;  %566 = vmatpush.msra.mxu1 %v202_v9 }
  0x26   : > { %567 = vmatpush.msra.mxu2 %v202_v9 }
  0x27   : > { %224 = vmatpush.msra.mxu0 %v201_v10  ;;  %568 = vmatpush.msra.mxu1 %v201_v10 }
  0x28   : > { %569 = vmatpush.msra.mxu2 %v201_v10 }
  0x29   : > { %225 = vmatpush.msra.mxu0 %v200_v11  ;;  %570 = vmatpush.msra.mxu1 %v200_v11 }
  0x2a   : > { %571 = vmatpush.msra.mxu2 %v200_v11 }
  0x2b   : > { %226 = vmatpush.msra.mxu0 %v199_v12  ;;  %572 = vmatpush.msra.mxu1 %v199_v12 }
  0x2c   : > { %573 = vmatpush.msra.mxu2 %v199_v12 }
  0x2d   : > { %227 = vmatpush.msra.mxu0 %v198_v13  ;;  %574 = vmatpush.msra.mxu1 %v198_v13 }
  0x2e   : > { %575 = vmatpush.msra.mxu2 %v198_v13 }
  0x2f   : > { %228 = vmatpush.msra.mxu0 %v197_v14  ;;  %576 = vmatpush.msra.mxu1 %v197_v14 }
  0x30   : > { %577 = vmatpush.msra.mxu2 %v197_v14 }
  0x31   : > { %229 = vmatpush.msra.mxu0 %v196_v15  ;;  %578 = vmatpush.msra.mxu1 %v196_v15 }
  0x32   : > { %579 = vmatpush.msra.mxu2 %v196_v15  ;;  %230 = vmatmul.f32.vlgmr.msra.gmra.mxu0 %v193_v16 }
  0x33   : > { %233 = vmatmul.f32.vlgmr.msra.gmra.mxu1 %v194_v17  ;;  %236 = vmatmul.f32.vlgmr.msra.gmra.mxu2 %v195_v18 }
  0xaf   : > { %v231_v20 = vpop.f32.mrf.mxu0 }
  0xb0   : > { %v232_v21 = vadd.f32 %v231_v20, %v213_v19  ;;  %v234_v22 = vpop.f32.mrf.mxu1 }
  0xb1   : > { %v235_v23 = vadd.f32 %v234_v22, %v213_v19 }
  0xb2   : > { %v532_v24 = vmul.f32 -1.442695, %v232_v21 }
  0xb3   : > { %v533_v25 = vmul.f32 -1.442695, %v235_v23 }
  0xb4   : > { %670 = vpow2.f32 %v532_v24 }
  0xb5   : > { %672 = vpow2.f32 %v533_v25 }
  0xb6   : > { %v237_v26 = vpop.f32.mrf.mxu2 }
  0xb7   : > { %v238_v27 = vadd.f32 %v237_v26, %v213_v19 }
  0xb9   : > { %v534_v28 = vmul.f32 -1.442695, %v238_v27 }
  0xba   : > { %v671_v29 = vpop.eup %670 }
  0xbb   : > { %v673_v30 = vpop.eup %672  ;;  %v249_v31 = vadd.f32 1.0, %v671_v29  ;;  %674 = vpow2.f32 %v534_v28 }
  0xbc   : > { %v250_v32 = vadd.f32 1.0, %v673_v30 }
  0xbd   : > { %676 = vrcp.f32 %v249_v31  ;;  %vm257_vm0 = vweird.f32 %v249_v31  ;;  %v263_v40 = vand.u32 2147483648, %v249_v31  ;;  %v261_v43 = vand.u32 2147483647, %v249_v31 }
  0xbe   : > { %678 = vrcp.f32 %v250_v32  ;;  %v278_v44 = vand.u32 2147483648, %v250_v32  ;;  %vm272_vm2 = vweird.f32 %v250_v32  ;;  %v276_v46 = vand.u32 2147483647, %v250_v32 }
  0xbf   : > { %v264_v49 = vor.u32 1.1754944e-38, %v263_v40  ;;  %vm262_vm6 = vcmp.eq.f32.partialorder %v261_v43, 8.507059e+37 }
  0xc0   : > { %v279_v53 = vor.u32 1.1754944e-38, %v278_v44  ;;  %vm277_vm8 = vcmp.eq.f32.partialorder %v276_v46, 8.507059e+37 }
  0xc1   : > { %v675_v33 = vpop.eup %674 }
  0xc2   : > { %v251_v34 = vadd.f32 1.0, %v675_v33 }
  0xc3   : > { %v677_v35 = vpop.eup %676 }
  0xc4   : > { %v679_v36 = vpop.eup %678  ;;  %v253_v37 = vmul.f32 %v677_v35, %v249_v31  ;;  %680 = vrcp.f32 %v251_v34  ;;  %vm258_vm1 = vweird.f32 %v677_v35  ;;  %v293_v58 = vand.u32 2147483648, %v251_v34 }
  0xc5   : > { %v268_v38 = vmul.f32 %v679_v36, %v250_v32  ;;  %vm273_vm3 = vweird.f32 %v679_v36  ;;  %vm259_vm4 = vmor %vm257_vm0, %vm258_vm1  ;;  %v291_v60 = vand.u32 2147483647, %v251_v34  ;;  %vm287_vm10 = vweird.f32 %v251_v34 }
  0xc6   : > { %v254_v39 = vsub.f32 1.0, %v253_v37  ;;  %vm274_vm7 = vmor %vm272_vm2, %vm273_vm3  ;;  %v294_v62 = vor.u32 1.1754944e-38, %v293_v58 }
  0xc7   : > { %v269_v41 = vsub.f32 1.0, %v268_v38  ;;  %vm292_vm12 = vcmp.eq.f32.partialorder %v291_v60, 8.507059e+37 }
  0xc8   : > { %v255_v42 = vmul.f32 %v677_v35, %v254_v39 }
  0xc9   : > { %v270_v45 = vmul.f32 %v679_v36, %v269_v41 }
  0xca   : > { %v681_v47 = vpop.eup %680  ;;  %v256_v48 = vadd.f32 %v677_v35, %v255_v42 }
  0xcb   : > { %v271_v50 = vadd.f32 %v679_v36, %v270_v45  ;;  %v283_v51 = vmul.f32 %v681_v47, %v251_v34  ;;  %vm288_vm9 = vweird.f32 %v681_v47 }
  0xcc   : > { %v260_v52 = vsel %vm259_vm4, %v677_v35, %v256_v48  ;;  %vm289_vm11 = vmor %vm287_vm10, %vm288_vm9 }
  0xcd   : > { %v265_v54 = vsel %vm262_vm6, %v264_v49, %v260_v52  ;;  %v275_v55 = vsel %vm274_vm7, %v679_v36, %v271_v50  ;;  %v284_v56 = vsub.f32 1.0, %v283_v51 }
  0xce   : > { %298 = vst.msk [vmem:[%s885_s14] sm:$0xff] %vm297_vm5, %v265_v54  ;;  %v280_v57 = vsel %vm277_vm8, %v279_v53, %v275_v55 }
  0xcf   : > { %299 = vst.msk [vmem:[%s885_s14 + $0x8] sm:$0xff] %vm297_vm5, %v280_v57  ;;  %v285_v59 = vmul.f32 %v681_v47, %v284_v56 }
  0xd1   : > { %v286_v61 = vadd.f32 %v681_v47, %v285_v59  ;;  %307 = sbr.rel (!%p824_p4) target bundleno = 268 (0x10c), region = 36 }
  0xd3   : > { %v290_v63 = vsel %vm289_vm11, %v681_v47, %v286_v61 }
  0xd4   : > { %v295_v0 = vsel %vm292_vm12, %v294_v62, %v290_v63 }
  0xd5   : > { %300 = vst.msk [vmem:[%s885_s14 + $0x10] sm:$0xff] %vm297_vm5, %v295_v0 }
  0xd6   : > { %s942_s18 = smov (!%p310_p8, %s309_s18), 3 }
  0xd7   : > { %s535_s25 = sshll.u32 %s942_s18, 3 }
  0xd8   : > { %p538_p9 = scmp.eq.s32.totalorder %s535_s25, 0 }
  0xd9   : > { %682 = sdivrem.u32 (!%p538_p9), %s942_s18, 3 }
  0xda   : > { %318 = sbr.rel (%p538_p9) target bundleno = 268 (0x10c), region = 40 }
  0xe2   : > { %s906_s21 = spop.drf %682 }
  0xe3   : > { %s684_s26 = spop.drf %682  ;;  %p539_p10 = scmp.le.s32.totalorder %s906_s21, 0 }
  0xe4   : > { %s744_s2 = smov (!%p539_p10), %s900_s24   ;;  %s748_s9 = smov (!%p539_p10), %s885_s14  }
  0xe5   : > { %483 = sbr.rel (%p539_p10) target bundleno = 242 (0xf2), region = 116  ;;  %s752_s27 = smov (!%p539_p10), 0  }
  0xe6   : > { %s756_s28 = smov (!%p539_p10), 0  }
  0xea LB: >> { %v387_v1 = vld [vmem:[%s750_s9] sm:$0xff]  ;;  %v389_v2 = vld [vmem:[%s750_s9 + $0x8] sm:$0xff]  ;;  %v391_v3 = vld [vmem:[%s750_s9 + $0x10] sm:$0xff]  ;;  %s393_s29 = sadd.s32 1, %s754_s27  ;;  %s381_s28 = sadd.s32 1, %s758_s28   ;;  %s758_s28 = sphi %s756_s28, %s381_s28   ;;  %s754_s27 = sphi %s752_s27, %s753_s27   ;;  %s750_s9 = sphi %s748_s9, %s398_s9   ;;  %s746_s2 = sphi %s744_s2, %s399_s2  }
  0xeb   : >> { %388 = vst [vmem:[%s746_s2] sm:$0xff] %v387_v1  ;;  %p394_p11 = scmp.ge.s32.totalorder %s393_s29, %s906_s21  ;;  %p380_p12 = scmp.ge.s32.totalorder %s381_s28, %s906_s21 }
  0xec   : >> { %390 = vst [vmem:[%s746_s2 + $0x8] sm:$0xff] %v389_v2 }
  0xed   : >> { %392 = vst [vmem:[%s746_s2 + $0x10] sm:$0xff] %v391_v3  ;;  %s944_s29 = smov (%p394_p11, %s393_s29), 0  ;;  %383 = sbr.rel (!%p380_p12) target bundleno = 234 (0xea), region = 122 }
  0xee   : >> { %s396_s30 = smul.u32 24, %s944_s29  ;;  %s753_s27 = smov %s944_s29  }
  0xf0   : >> { %s398_s9 = scalar_lea.vmem %s885_s14, %s396_s30 [#allocation3]   ;;  %s399_s2 = scalar_lea.vmem %s900_s24, %s396_s30  }
  0xf2 PF: > { %685 = sdivrem.u32 %s942_s18, 3 }
  0xf3   : > { %s540_s4 = smul.u32 24, %s906_s21 }
  0xf5   : > { %s918_s5 = scalar_lea.vmem %s885_s14, %s540_s4 [#allocation3]   ;;  %s406_s6 = scalar_lea.vmem %s900_s24, %s540_s4  }
  0xfb   : > { %s686_s7 = spop.drf %685 }
  0xfc   : > { %s687_s8 = spop.drf %685 }
  0xfd   : > { %p542_p13 = scmp.le.s32.totalorder %s687_s8, 0 }
  0xfe   : > { %s760_s10 = smov (!%p542_p13), %s406_s6   ;;  %s764_s11 = smov (!%p542_p13), %s918_s5  }
  0xff   : > { %497 = sbr.rel (%p542_p13) target bundleno = 268 (0x10c), region = 127  ;;  %s768_s12 = smov (!%p542_p13), 0  }
 0x100   : > { %s772_s13 = smov (!%p542_p13), 0  }
 0x104 LB: >> { %v416_v4 = vld [vmem:[%s766_s11] sm:$0xff]  ;;  %s418_s16 = sadd.s32 1, %s770_s12  ;;  %s410_s13 = sadd.s32 1, %s774_s13   ;;  %s774_s13 = sphi %s772_s13, %s410_s13   ;;  %s770_s12 = sphi %s768_s12, %s769_s12   ;;  %s766_s11 = sphi %s764_s11, %s423_s11   ;;  %s762_s10 = sphi %s760_s10, %s424_s10  }
 0x105   : >> { %417 = vst [vmem:[%s762_s10] sm:$0xff] %v416_v4  ;;  %p419_p0 = scmp.ge.s32.totalorder %s418_s16, %s687_s8  ;;  %p409_p1 = scmp.ge.s32.totalorder %s410_s13, %s687_s8 }
 0x107   : >> { %s946_s16 = smov (%p419_p0, %s418_s16), 0  ;;  %412 = sbr.rel (!%p409_p1) target bundleno = 260 (0x104), region = 133 }
 0x108   : >> { %s543_s14 = sshll.u32 %s946_s16, 3  ;;  %s769_s12 = smov %s946_s16  }
 0x109   : >> { %s423_s11 = scalar_lea.vmem %s918_s5, %s543_s14 [#allocation3]   ;;  %s424_s10 = scalar_lea.vmem %s406_s6, %s543_s14  }
 0x10c PF: > { %p11_p2 = scmp.ge.s32.totalorder %s814_s17, 6   ;;  %s938_s14 = smov %s738_s15 }
 0x10d   : > { %s939_s15 = smov %s822_s20  ;;  %s940_s16 = smov %s814_s17 }
 0x10e   :  { %13 = sbr.rel (!%p11_p2) target bundleno = 4 (0x4), region = 144 }

</bundles_post_ra>
